<compile_context>
chip_gen: v6e
topology: v6e:2x2x1
jax: 0.10.0
libtpu: 0.0.40
codegen_flags: <defaults>
</compile_context>

<pallas_src>
import functools

import jax
import jax.numpy as jnp
from jax.experimental import pallas as pl
from jax.experimental.pallas import tpu as pltpu

_VMEM_LIMIT = 48 * 1024 * 1024  # fits v7x's 64 MiB physical VMEM with headroom


# ---------------------------------------------------------------------------
# Pallas kernels
# ---------------------------------------------------------------------------
def _transform_kernel(x_ref, w_ref, o_ref):
    """Row-tiled feature transform: o_tile = x_tile @ W (computed once/layer)."""
    o_ref[...] = jnp.dot(x_ref[...], w_ref[...],
                         preferred_element_type=jnp.float32)


def _linear_kernel(x_ref, w_ref, b_ref, o_ref):
    """Row-tiled dense layer: o_tile = x_tile @ W + b (classifier head)."""
    o_ref[...] = (jnp.dot(x_ref[...], w_ref[...],
                          preferred_element_type=jnp.float32) + b_ref[...])


def _aggregate_kernel(a_ref, xw_ref, b_ref, o_ref, *, relu):
    """Row-tiled aggregation: o_tile = [relu](A_tile @ xw + b).

    A_tile is bf16 (streamed from HBM); xw is small and resident, cast to bf16
    so the MXU runs the bf16 path with f32 accumulation.
    """
    acc = jnp.dot(a_ref[...], xw_ref[...].astype(jnp.bfloat16),
                  preferred_element_type=jnp.float32)
    acc = acc + b_ref[...]
    if relu:
        acc = jnp.maximum(acc, 0.0)
    o_ref[...] = acc


# ---------------------------------------------------------------------------
# Glue: sparse edges -> dense GCN-normalized adjacency (PyG GCNConv semantics)
# ---------------------------------------------------------------------------
def build_normalized_adjacency(edge_index, edge_weight, num_nodes):
    # TODO(synk): for large sparse graphs, replace the dense N x N adjacency
    # with a sorted-edge segment-sum / scalar-prefetch gather kernel.
    row = edge_index[0]  # source
    col = edge_index[1]  # target
    loop = jnp.arange(num_nodes, dtype=edge_index.dtype)
    row = jnp.concatenate([row, loop])
    col = jnp.concatenate([col, loop])
    ew = jnp.concatenate(
        [edge_weight.astype(jnp.float32), jnp.ones((num_nodes,), jnp.float32)])
    deg = jnp.zeros((num_nodes,), jnp.float32).at[col].add(ew)
    dinv = jnp.where(deg > 0, jax.lax.rsqrt(deg), 0.0)
    norm = dinv[row] * ew * dinv[col]
    # out[target] += norm * x[source]  <=>  A_hat[target, source] = norm
    a_hat = jnp.zeros((num_nodes, num_nodes), jnp.float32).at[col, row].add(norm)
    return a_hat  # f32; cast to bf16 only after the f32 degree/rsqrt math


# ---------------------------------------------------------------------------
# Padding / tiling helpers
# ---------------------------------------------------------------------------
def _round_up(v, m):
    return (v + m - 1) // m * m


def _pad2(a, rows, cols):
    return jnp.pad(a, ((0, rows - a.shape[0]), (0, cols - a.shape[1])))


def _pick_tm(n_pad, f_pad, budget=40 << 20):
    """Largest row-tile whose double-buffered working set fits the budget."""
    for tm in (512, 256, 128):
        if n_pad % tm:
            continue
        a_bytes = 2 * tm * n_pad * 2          # A tile, bf16, double-buffered
        xw_bytes = 2 * n_pad * f_pad * 4      # resident transformed features
        io_bytes = 2 * tm * f_pad * 4 * 2     # x / output tiles
        if a_bytes + xw_bytes + io_bytes <= budget:
            return tm
    return 128


def _row_parallel_params():
    return pltpu.CompilerParams(dimension_semantics=("parallel",),
                                vmem_limit_bytes=_VMEM_LIMIT)


# ---------------------------------------------------------------------------
# pallas_call wrappers
# ---------------------------------------------------------------------------
def _transform(x, w, *, tm):
    n_pad, k = x.shape
    f = w.shape[1]
    return pl.pallas_call(
        _transform_kernel,
        out_shape=jax.ShapeDtypeStruct((n_pad, f), jnp.float32),
        grid=(n_pad // tm,),
        in_specs=[pl.BlockSpec((tm, k), lambda i: (i, 0)),
                  pl.BlockSpec((k, f), lambda i: (0, 0))],
        out_specs=pl.BlockSpec((tm, f), lambda i: (i, 0)),
        compiler_params=_row_parallel_params(),
    )(x, w)


def _linear(x, w, b, *, tm):
    n_pad, k = x.shape
    f = w.shape[1]
    return pl.pallas_call(
        _linear_kernel,
        out_shape=jax.ShapeDtypeStruct((n_pad, f), jnp.float32),
        grid=(n_pad // tm,),
        in_specs=[pl.BlockSpec((tm, k), lambda i: (i, 0)),
                  pl.BlockSpec((k, f), lambda i: (0, 0)),
                  pl.BlockSpec((1, f), lambda i: (0, 0))],
        out_specs=pl.BlockSpec((tm, f), lambda i: (i, 0)),
        compiler_params=_row_parallel_params(),
    )(x, w, b)


def _aggregate(a, xw, b, *, relu, tm):
    n_pad = a.shape[0]
    f = xw.shape[1]
    cost = pl.CostEstimate(
        flops=2 * n_pad * n_pad * f,
        transcendentals=0,
        bytes_accessed=n_pad * n_pad * a.dtype.itemsize + 2 * n_pad * f * 4,
    )
    return pl.pallas_call(
        functools.partial(_aggregate_kernel, relu=relu),
        out_shape=jax.ShapeDtypeStruct((n_pad, f), jnp.float32),
        grid=(n_pad // tm,),
        in_specs=[pl.BlockSpec((tm, n_pad), lambda i: (i, 0)),   # A row tile
                  pl.BlockSpec((n_pad, f), lambda i: (0, 0)),    # xw resident
                  pl.BlockSpec((1, f), lambda i: (0, 0))],       # bias resident
        out_specs=pl.BlockSpec((tm, f), lambda i: (i, 0)),
        compiler_params=_row_parallel_params(),
        cost_estimate=cost,
    )(a, xw, b)


# ---------------------------------------------------------------------------
# Forward pass
# ---------------------------------------------------------------------------
@functools.partial(jax.jit, static_argnames=("linear",))
def gcn_forward(x, edge_index, edge_weight, params, *, linear=False):
    n, f_in = x.shape
    hid = params["w1"].shape[1]
    out2 = params["w2"].shape[1]

    n_pad = _round_up(n, 128)
    f_in_pad = _round_up(f_in, 128)
    hid_pad = _round_up(hid, 128)
    out2_pad = _round_up(out2, 128)

    # Normalized adjacency: f32 math, padded, then cast to bf16 for streaming.
    a = build_normalized_adjacency(edge_index, edge_weight, n)
    a = _pad2(a, n_pad, n_pad).astype(jnp.bfloat16)

    xp = _pad2(x.astype(jnp.float32), n_pad, f_in_pad)
    w1 = _pad2(params["w1"], f_in_pad, hid_pad)
    b1 = _pad2(params["b1"], 1, hid_pad)
    w2 = _pad2(params["w2"], hid_pad, out2_pad)
    b2 = _pad2(params["b2"], 1, out2_pad)

    tm = _pick_tm(n_pad, max(f_in_pad, hid_pad, out2_pad))

    # Layer 1: transform once, then stream A row tiles.
    xw1 = _transform(xp, w1, tm=tm)
    h = _aggregate(a, xw1, b1, relu=True, tm=tm)
    # F.dropout(training=False) == identity in eval mode.
    # TODO(synk): training-mode dropout not implemented (eval semantics only).

    # Layer 2.
    xw2 = _transform(h, w2, tm=tm)
    out = _aggregate(a, xw2, b2, relu=linear, tm=tm)

    if linear:
        out_ch = params["wc"].shape[1]
        out_ch_pad = _round_up(out_ch, 128)
        wc = _pad2(params["wc"], out2_pad, out_ch_pad)
        bc = _pad2(params["bc"], 1, out_ch_pad)
        out = _linear(out, wc, bc, tm=tm)
        return out[:n, :out_ch]
    return out[:n, :out2]


# ---------------------------------------------------------------------------
# Deterministic parameter init (glorot for GCNConv weights, zeros for biases)
# ---------------------------------------------------------------------------
def init_params(key, in_channels, hidden_channels, out_channels, linear=False):
    k1, k2, k3 = jax.random.split(key, 3)

    def glorot(k, fan_in, fan_out):
        lim = jnp.sqrt(6.0 / (fan_in + fan_out))
        return jax.random.uniform(k, (fan_in, fan_out), jnp.float32, -lim, lim)

    p = {
        "w1": glorot(k1, in_channels, hidden_channels),
        "b1": jnp.zeros((1, hidden_channels), jnp.float32),
    }
    second_out = hidden_channels if linear else out_channels
    p["w2"] = glorot(k2, hidden_channels, second_out)
    p["b2"] = jnp.zeros((1, second_out), jnp.float32)
    if linear:
        p["wc"] = glorot(k3, hidden_channels, out_channels)
        p["bc"] = jnp.zeros((1, out_channels), jnp.float32)
    return p


if __name__ == "__main__":
    # Small synthetic graph consistent with the module's forward signature.
    N = 16            # nodes
    E = 40            # directed edges
    IN_CH = 4
    HIDDEN = 32
    OUT_CH = 4

    key = jax.random.PRNGKey(0)
    kx, ke, kw, kp = jax.random.split(key, 4)

    x = jax.random.normal(kx, (N, IN_CH), jnp.float32)
    edge_index = jax.random.randint(ke, (2, E), 0, N, dtype=jnp.int32)
    edge_weight = jax.random.uniform(kw, (E,), jnp.float32, 0.1, 1.0)

    # args.linear == 0 path (args.weighted == 1 path is used).
    params = init_params(kp, IN_CH, HIDDEN, OUT_CH, linear=False)
    out = gcn_forward(x, edge_index, edge_weight, params, linear=False)
    jax.block_until_ready(out)
    assert out.shape == (N, OUT_CH) and out.dtype == jnp.float32

    # args.linear == 1 path (relu + classifier head).
    params_lin = init_params(kp, IN_CH, HIDDEN, OUT_CH, linear=True)
    out_lin = gcn_forward(x, edge_index, edge_weight, params_lin, linear=True)
    jax.block_until_ready(out_lin)
    assert out_lin.shape == (N, OUT_CH) and out_lin.dtype == jnp.float32

    print("KERNEL_OK")
</pallas_src>

<mosaic_0001>
module attributes {stable_mosaic.version = 11 : i64} {
  func.func private @main(%arg0: i32) attributes {dimension_semantics = [#tpu.dimension_semantics<core_parallel>], iteration_bounds = array<i64: 2>, tpu.core_type = #tpu.core_type<sc_scalar_subcore>, window_params = []} {
    return
  }
}

module attributes {stable_mosaic.version = 11 : i64} {
  func.func private @main(%arg0: i32) attributes {dimension_semantics = [#tpu.dimension_semantics<core_parallel>], iteration_bounds = array<i64: 2>, tpu.core_type = #tpu.core_type<sc_scalar_subcore>, window_params = []} {
    return
  }
}

module attributes {stable_mosaic.version = 11 : i64} {
  func.func @_transform_kernel(%arg0: i32, %arg1: memref<128x128xf32, #tpu.memory_space<vmem>>, %arg2: memref<128x128xf32, #tpu.memory_space<vmem>>, %arg3: memref<128x128xf32, #tpu.memory_space<vmem>>) attributes {dimension_semantics = [#tpu.dimension_semantics<parallel>], iteration_bounds = array<i64: 1>, scalar_prefetch = 0 : i64, scratch_operands = 0 : i64, tpu.core_type = #tpu.core_type<tc>, window_params = [{transform_indices = @transform_0, window_bounds = array<i64: 128, 128>}, {pipeline_mode = #tpu.pipeline_mode<synchronous>, transform_indices = @transform_1, window_bounds = array<i64: 128, 128>}, {transform_indices = @transform_2, window_bounds = array<i64: 128, 128>}]} {
    %c0 = arith.constant 0 : index
    %c0_0 = arith.constant 0 : index
    %0 = vector.load %arg1[%c0, %c0_0] : memref<128x128xf32, #tpu.memory_space<vmem>>, vector<128x128xf32>
    %c0_1 = arith.constant 0 : index
    %c0_2 = arith.constant 0 : index
    %1 = vector.load %arg2[%c0_1, %c0_2] : memref<128x128xf32, #tpu.memory_space<vmem>>, vector<128x128xf32>
    %cst = arith.constant dense<0.000000e+00> : vector<128x128xf32>
    %2 = tpu.matmul %0, %1, %cst {dimension_numbers = #tpu.dot_dimension_numbers<[1], [0], [0], [1], [0, 0, 1, 1], [], []>} : vector<128x128xf32>, vector<128x128xf32>, vector<128x128xf32> -> vector<128x128xf32>
    %c0_3 = arith.constant 0 : index
    %c0_4 = arith.constant 0 : index
    %3 = vector.load %arg3[%c0_3, %c0_4] : memref<128x128xf32, #tpu.memory_space<vmem>>, vector<128x128xf32>
    tpu.vector_store %arg3[%c0_3, %c0_4], %2 {strides = array<i32>} : memref<128x128xf32, #tpu.memory_space<vmem>>, vector<128x128xf32>,
    return
  }
  func.func @transform_0(%arg0: i32) -> (i32, i32) {
    %c0_i32 = arith.constant 0 : i32
    %c0_i32_0 = arith.constant 0 : i32
    return %arg0, %c0_i32 : i32, i32
  }
  func.func @transform_1(%arg0: i32) -> (i32, i32) {
    %c0_i32 = arith.constant 0 : i32
    %c0_i32_0 = arith.constant 0 : i32
    %c0_i32_1 = arith.constant 0 : i32
    return %c0_i32, %c0_i32_0 : i32, i32
  }
  func.func @transform_2(%arg0: i32) -> (i32, i32) {
    %c0_i32 = arith.constant 0 : i32
    %c0_i32_0 = arith.constant 0 : i32
    return %arg0, %c0_i32 : i32, i32
  }
}

module attributes {stable_mosaic.version = 11 : i64} {
  func.func @_aggregate_kernel(%arg0: i32, %arg1: memref<128x128xbf16, #tpu.memory_space<vmem>>, %arg2: memref<128x128xf32, #tpu.memory_space<vmem>>, %arg3: memref<1x128xf32, #tpu.memory_space<vmem>>, %arg4: memref<128x128xf32, #tpu.memory_space<vmem>>) attributes {dimension_semantics = [#tpu.dimension_semantics<parallel>], iteration_bounds = array<i64: 1>, scalar_prefetch = 0 : i64, scratch_operands = 0 : i64, tpu.core_type = #tpu.core_type<tc>, window_params = [{transform_indices = @transform_0, window_bounds = array<i64: 128, 128>}, {pipeline_mode = #tpu.pipeline_mode<synchronous>, transform_indices = @transform_1, window_bounds = array<i64: 128, 128>}, {pipeline_mode = #tpu.pipeline_mode<synchronous>, transform_indices = @transform_2, window_bounds = array<i64: 1, 128>}, {transform_indices = @transform_3, window_bounds = array<i64: 128, 128>}]} {
    %c0 = arith.constant 0 : index
    %c0_0 = arith.constant 0 : index
    %0 = vector.load %arg1[%c0, %c0_0] : memref<128x128xbf16, #tpu.memory_space<vmem>>, vector<128x128xbf16>
    %c0_1 = arith.constant 0 : index
    %c0_2 = arith.constant 0 : index
    %1 = vector.load %arg2[%c0_1, %c0_2] : memref<128x128xf32, #tpu.memory_space<vmem>>, vector<128x128xf32>
    %2 = arith.truncf %1 : vector<128x128xf32> to vector<128x128xbf16>
    %cst = arith.constant dense<0.000000e+00> : vector<128x128xf32>
    %3 = tpu.matmul %0, %2, %cst {dimension_numbers = #tpu.dot_dimension_numbers<[1], [0], [0], [1], [0, 0, 1, 1], [], []>} : vector<128x128xbf16>, vector<128x128xbf16>, vector<128x128xf32> -> vector<128x128xf32>
    %c0_3 = arith.constant 0 : index
    %c0_4 = arith.constant 0 : index
    %4 = vector.load %arg3[%c0_3, %c0_4] : memref<1x128xf32, #tpu.memory_space<vmem>>, vector<1x128xf32>
    %5 = vector.broadcast %4 : vector<1x128xf32> to vector<128x128xf32>
    %6 = arith.addf %3, %5 : vector<128x128xf32>
    %c0_5 = arith.constant 0 : index
    %c0_6 = arith.constant 0 : index
    %7 = vector.load %arg4[%c0_5, %c0_6] : memref<128x128xf32, #tpu.memory_space<vmem>>, vector<128x128xf32>
    tpu.vector_store %arg4[%c0_5, %c0_6], %6 {strides = array<i32>} : memref<128x128xf32, #tpu.memory_space<vmem>>, vector<128x128xf32>,
    return
  }
  func.func @transform_0(%arg0: i32) -> (i32, i32) {
    %c0_i32 = arith.constant 0 : i32
    %c0_i32_0 = arith.constant 0 : i32
    return %arg0, %c0_i32 : i32, i32
  }
  func.func @transform_1(%arg0: i32) -> (i32, i32) {
    %c0_i32 = arith.constant 0 : i32
    %c0_i32_0 = arith.constant 0 : i32
    %c0_i32_1 = arith.constant 0 : i32
    return %c0_i32, %c0_i32_0 : i32, i32
  }
  func.func @transform_2(%arg0: i32) -> (i32, i32) {
    %c0_i32 = arith.constant 0 : i32
    %c0_i32_0 = arith.constant 0 : i32
    %c0_i32_1 = arith.constant 0 : i32
    return %c0_i32, %c0_i32_0 : i32, i32
  }
  func.func @transform_3(%arg0: i32) -> (i32, i32) {
    %c0_i32 = arith.constant 0 : i32
    %c0_i32_0 = arith.constant 0 : i32
    return %arg0, %c0_i32 : i32, i32
  }
}

module attributes {stable_mosaic.version = 11 : i64} {
  func.func @_aggregate_kernel(%arg0: i32, %arg1: memref<128x128xbf16, #tpu.memory_space<vmem>>, %arg2: memref<128x128xf32, #tpu.memory_space<vmem>>, %arg3: memref<1x128xf32, #tpu.memory_space<vmem>>, %arg4: memref<128x128xf32, #tpu.memory_space<vmem>>) attributes {dimension_semantics = [#tpu.dimension_semantics<parallel>], iteration_bounds = array<i64: 1>, scalar_prefetch = 0 : i64, scratch_operands = 0 : i64, tpu.core_type = #tpu.core_type<tc>, window_params = [{transform_indices = @transform_0, window_bounds = array<i64: 128, 128>}, {pipeline_mode = #tpu.pipeline_mode<synchronous>, transform_indices = @transform_1, window_bounds = array<i64: 128, 128>}, {pipeline_mode = #tpu.pipeline_mode<synchronous>, transform_indices = @transform_2, window_bounds = array<i64: 1, 128>}, {transform_indices = @transform_3, window_bounds = array<i64: 128, 128>}]} {
    %c0 = arith.constant 0 : index
    %c0_0 = arith.constant 0 : index
    %0 = vector.load %arg1[%c0, %c0_0] : memref<128x128xbf16, #tpu.memory_space<vmem>>, vector<128x128xbf16>
    %c0_1 = arith.constant 0 : index
    %c0_2 = arith.constant 0 : index
    %1 = vector.load %arg2[%c0_1, %c0_2] : memref<128x128xf32, #tpu.memory_space<vmem>>, vector<128x128xf32>
    %2 = arith.truncf %1 : vector<128x128xf32> to vector<128x128xbf16>
    %cst = arith.constant dense<0.000000e+00> : vector<128x128xf32>
    %3 = tpu.matmul %0, %2, %cst {dimension_numbers = #tpu.dot_dimension_numbers<[1], [0], [0], [1], [0, 0, 1, 1], [], []>} : vector<128x128xbf16>, vector<128x128xbf16>, vector<128x128xf32> -> vector<128x128xf32>
    %c0_3 = arith.constant 0 : index
    %c0_4 = arith.constant 0 : index
    %4 = vector.load %arg3[%c0_3, %c0_4] : memref<1x128xf32, #tpu.memory_space<vmem>>, vector<1x128xf32>
    %5 = vector.broadcast %4 : vector<1x128xf32> to vector<128x128xf32>
    %6 = arith.addf %3, %5 : vector<128x128xf32>
    %cst_5 = arith.constant 0.000000e+00 : f32
    %7 = vector.broadcast %cst_5 : f32 to vector<128x128xf32>
    %8 = arith.maximumf %6, %7 : vector<128x128xf32>
    %c0_6 = arith.constant 0 : index
    %c0_7 = arith.constant 0 : index
    %9 = vector.load %arg4[%c0_6, %c0_7] : memref<128x128xf32, #tpu.memory_space<vmem>>, vector<128x128xf32>
    tpu.vector_store %arg4[%c0_6, %c0_7], %8 {strides = array<i32>} : memref<128x128xf32, #tpu.memory_space<vmem>>, vector<128x128xf32>,
    return
  }
  func.func @transform_0(%arg0: i32) -> (i32, i32) {
    %c0_i32 = arith.constant 0 : i32
    %c0_i32_0 = arith.constant 0 : i32
    return %arg0, %c0_i32 : i32, i32
  }
  func.func @transform_1(%arg0: i32) -> (i32, i32) {
    %c0_i32 = arith.constant 0 : i32
    %c0_i32_0 = arith.constant 0 : i32
    %c0_i32_1 = arith.constant 0 : i32
    return %c0_i32, %c0_i32_0 : i32, i32
  }
  func.func @transform_2(%arg0: i32) -> (i32, i32) {
    %c0_i32 = arith.constant 0 : i32
    %c0_i32_0 = arith.constant 0 : i32
    %c0_i32_1 = arith.constant 0 : i32
    return %c0_i32, %c0_i32_0 : i32, i32
  }
  func.func @transform_3(%arg0: i32) -> (i32, i32) {
    %c0_i32 = arith.constant 0 : i32
    %c0_i32_0 = arith.constant 0 : i32
    return %arg0, %c0_i32 : i32, i32
  }
}

</mosaic_0001>

<bundles_post_ra>
// kernel: gcn_forward.4
= control target key start
LH: loop header
LB: loop body
LE: loop exit
PB: predicated region body
PF: predicated region fallthrough
CT: control target
= control target key end

     0   :  { %s487_s1 = inlined_call_operand.vmem [shape: f32[128,128], index: 1, kind: input, shape index: {}]   ;;  %s488_s0 = inlined_call_operand.vmem [shape: f32[128,128], index: 0, kind: input, shape index: {}]   ;;  %s489_s2 = inlined_call_operand.vmem [shape: f32[128,128], index: 2, kind: output, shape index: {}]  }
   0x1   :  { %v42_v0 = vld [vmem:[%s487_s1 + $0x78] sm:$0xff]  ;;  %v41_v1 = vld [vmem:[%s487_s1 + $0x70] sm:$0xff]  ;;  %v40_v2 = vld [vmem:[%s487_s1 + $0x68] sm:$0xff] }
   0x2   :  { %240 = vmatprep.subr.mxu0 %v42_v0  ;;  %296 = vmatprep.subr.mxu1 %v42_v0  ;;  %v39_v3 = vld [vmem:[%s487_s1 + $0x60] sm:$0xff]  ;;  %v38_v4 = vld [vmem:[%s487_s1 + $0x58] sm:$0xff]  ;;  %v37_v5 = vld [vmem:[%s487_s1 + $0x50] sm:$0xff] }
   0x3   :  { %241 = vmatpush3.msra.mxu0 %v42_v0  ;;  %312 = vmatpush3.msra.mxu1 %v42_v0  ;;  %v36_v6 = vld [vmem:[%s487_s1 + $0x48] sm:$0xff]  ;;  %v35_v7 = vld [vmem:[%s487_s1 + $0x40] sm:$0xff]  ;;  %v34_v8 = vld [vmem:[%s487_s1 + $0x38] sm:$0xff] }
   0x4   :  { %242 = vmatprep.subr.mxu0 %v41_v1  ;;  %297 = vmatprep.subr.mxu1 %v41_v1  ;;  %v33_v9 = vld [vmem:[%s487_s1 + $0x30] sm:$0xff]  ;;  %v32_v10 = vld [vmem:[%s487_s1 + $0x28] sm:$0xff]  ;;  %v31_v11 = vld [vmem:[%s487_s1 + $0x20] sm:$0xff] }
   0x5   :  { %243 = vmatpush3.msra.mxu0 %v41_v1  ;;  %313 = vmatpush3.msra.mxu1 %v41_v1  ;;  %v30_v12 = vld [vmem:[%s487_s1 + $0x18] sm:$0xff]  ;;  %v29_v13 = vld [vmem:[%s487_s1 + $0x10] sm:$0xff]  ;;  %v28_v14 = vld [vmem:[%s487_s1 + $0x8] sm:$0xff] }
   0x6   :  { %244 = vmatprep.subr.mxu0 %v40_v2  ;;  %298 = vmatprep.subr.mxu1 %v40_v2  ;;  %v27_v15 = vld [vmem:[%s487_s1] sm:$0xff]  ;;  %v12_v18 = vld [vmem:[%s488_s0 + $0x8] sm:$0xff]  ;;  %v13_v20 = vld [vmem:[%s488_s0 + $0x10] sm:$0xff] }
   0x7   :  { %245 = vmatpush3.msra.mxu0 %v40_v2  ;;  %314 = vmatpush3.msra.mxu1 %v40_v2  ;;  %v11_v16 = vld [vmem:[%s488_s0] sm:$0xff]  ;;  %v20_v19 = vld [vmem:[%s488_s0 + $0x48] sm:$0xff]  ;;  %v21_v21 = vld [vmem:[%s488_s0 + $0x50] sm:$0xff] }
   0x8   :  { %246 = vmatprep.subr.mxu0 %v39_v3  ;;  %299 = vmatprep.subr.mxu1 %v39_v3  ;;  %v19_v17 = vld [vmem:[%s488_s0 + $0x40] sm:$0xff]  ;;  %v14_v22 = vld [vmem:[%s488_s0 + $0x18] sm:$0xff]  ;;  %v16_v26 = vld [vmem:[%s488_s0 + $0x28] sm:$0xff] }
   0x9   :  { %247 = vmatpush3.msra.mxu0 %v39_v3  ;;  %315 = vmatpush3.msra.mxu1 %v39_v3  ;;  %v22_v23 = vld [vmem:[%s488_s0 + $0x58] sm:$0xff]  ;;  %v15_v24 = vld [vmem:[%s488_s0 + $0x20] sm:$0xff]  ;;  %v24_v27 = vld [vmem:[%s488_s0 + $0x68] sm:$0xff] }
   0xa   :  { %248 = vmatprep.subr.mxu0 %v38_v4  ;;  %300 = vmatprep.subr.mxu1 %v38_v4  ;;  %v23_v25 = vld [vmem:[%s488_s0 + $0x60] sm:$0xff]  ;;  %v17_v28 = vld [vmem:[%s488_s0 + $0x30] sm:$0xff]  ;;  %v18_v30 = vld [vmem:[%s488_s0 + $0x38] sm:$0xff] }
   0xb   :  { %249 = vmatpush3.msra.mxu0 %v38_v4  ;;  %316 = vmatpush3.msra.mxu1 %v38_v4  ;;  %v25_v29 = vld [vmem:[%s488_s0 + $0x70] sm:$0xff]  ;;  %v26_v31 = vld [vmem:[%s488_s0 + $0x78] sm:$0xff] }
   0xc   :  { %250 = vmatprep.subr.mxu0 %v37_v5  ;;  %301 = vmatprep.subr.mxu1 %v37_v5 }
   0xd   :  { %251 = vmatpush3.msra.mxu0 %v37_v5  ;;  %317 = vmatpush3.msra.mxu1 %v37_v5 }
   0xe   :  { %252 = vmatprep.subr.mxu0 %v36_v6  ;;  %302 = vmatprep.subr.mxu1 %v36_v6 }
   0xf   :  { %253 = vmatpush3.msra.mxu0 %v36_v6  ;;  %318 = vmatpush3.msra.mxu1 %v36_v6 }
  0x10   :  { %254 = vmatprep.subr.mxu0 %v35_v7  ;;  %303 = vmatprep.subr.mxu1 %v35_v7 }
  0x11   :  { %255 = vmatpush3.msra.mxu0 %v35_v7  ;;  %319 = vmatpush3.msra.mxu1 %v35_v7 }
  0x12   :  { %256 = vmatprep.subr.mxu0 %v34_v8  ;;  %304 = vmatprep.subr.mxu1 %v34_v8 }
  0x13   :  { %257 = vmatpush3.msra.mxu0 %v34_v8  ;;  %320 = vmatpush3.msra.mxu1 %v34_v8 }
  0x14   :  { %258 = vmatprep.subr.mxu0 %v33_v9  ;;  %305 = vmatprep.subr.mxu1 %v33_v9 }
  0x15   :  { %259 = vmatpush3.msra.mxu0 %v33_v9  ;;  %321 = vmatpush3.msra.mxu1 %v33_v9 }
  0x16   :  { %260 = vmatprep.subr.mxu0 %v32_v10  ;;  %306 = vmatprep.subr.mxu1 %v32_v10 }
  0x17   :  { %261 = vmatpush3.msra.mxu0 %v32_v10  ;;  %322 = vmatpush3.msra.mxu1 %v32_v10 }
  0x18   :  { %262 = vmatprep.subr.mxu0 %v31_v11  ;;  %307 = vmatprep.subr.mxu1 %v31_v11 }
  0x19   :  { %263 = vmatpush3.msra.mxu0 %v31_v11  ;;  %323 = vmatpush3.msra.mxu1 %v31_v11 }
  0x1a   :  { %264 = vmatprep.subr.mxu0 %v30_v12  ;;  %308 = vmatprep.subr.mxu1 %v30_v12 }
  0x1b   :  { %265 = vmatpush3.msra.mxu0 %v30_v12  ;;  %324 = vmatpush3.msra.mxu1 %v30_v12 }
  0x1c   :  { %266 = vmatprep.subr.mxu0 %v29_v13  ;;  %309 = vmatprep.subr.mxu1 %v29_v13 }
  0x1d   :  { %267 = vmatpush3.msra.mxu0 %v29_v13  ;;  %325 = vmatpush3.msra.mxu1 %v29_v13 }
  0x1e   :  { %268 = vmatprep.subr.mxu0 %v28_v14  ;;  %310 = vmatprep.subr.mxu1 %v28_v14 }
  0x1f   :  { %269 = vmatpush3.msra.mxu0 %v28_v14  ;;  %326 = vmatpush3.msra.mxu1 %v28_v14 }
  0x20   :  { %270 = vmatprep.subr.mxu0 %v27_v15  ;;  %311 = vmatprep.subr.mxu1 %v27_v15 }
  0x21   :  { %271 = vmatpush3.msra.mxu0 %v27_v15  ;;  %327 = vmatpush3.msra.mxu1 %v27_v15 }
  0x22   :  { %272 = vmatprep.mubr.f32.mxu0 %v11_v16  ;;  %284 = vmatprep.mubr.f32.mxu1 %v19_v17 }
  0x23   :  { %273 = vmatmul.mubr.f32.vlgmr.msra.gmra.mxu0 %v12_v18  ;;  %285 = vmatmul.mubr.f32.vlgmr.msra.gmra.mxu1 %v20_v19 }
  0x24   :  { %275 = vmatprep.mubr.f32.mxu0 %v13_v20  ;;  %287 = vmatprep.mubr.f32.mxu1 %v21_v21 }
  0x27   :  { %276 = vmatmul.mubr.f32.gmra.mxu0 %v14_v22  ;;  %288 = vmatmul.mubr.f32.gmra.mxu1 %v22_v23 }
  0x28   :  { %278 = vmatprep.mubr.f32.mxu0 %v15_v24  ;;  %290 = vmatprep.mubr.f32.mxu1 %v23_v25 }
  0x2b   :  { %279 = vmatmul.mubr.f32.gmra.mxu0 %v16_v26  ;;  %291 = vmatmul.mubr.f32.gmra.mxu1 %v24_v27 }
  0x2c   :  { %281 = vmatprep.mubr.f32.mxu0 %v17_v28  ;;  %293 = vmatprep.mubr.f32.mxu1 %v25_v29 }
  0x2f   :  { %282 = vmatmul.mubr.f32.gmra.mxu0 %v18_v30  ;;  %294 = vmatmul.mubr.f32.gmra.mxu1 %v26_v31 }
  0xe3   :  { %v274_v32 = vpop.f32.mrf.mxu0  ;;  %v286_v33 = vpop.f32.mrf.mxu1 }
  0xe4   :  { %189 = vst [vmem:[%s489_s2 + $0x8] sm:$0xff] %v274_v32  ;;  %197 = vst [vmem:[%s489_s2 + $0x48] sm:$0xff] %v286_v33 }
  0xe5   :  { %v109_v34 = vpop.f32.mrf.mxu0  ;;  %v149_v35 = vpop.f32.mrf.mxu1 }
  0xe6   :  { %188 = vst [vmem:[%s489_s2] sm:$0xff] %v109_v34  ;;  %196 = vst [vmem:[%s489_s2 + $0x40] sm:$0xff] %v149_v35 }
  0xe7   :  { %v277_v36 = vpop.f32.mrf.mxu0  ;;  %v289_v37 = vpop.f32.mrf.mxu1 }
  0xe8   :  { %191 = vst [vmem:[%s489_s2 + $0x18] sm:$0xff] %v277_v36  ;;  %199 = vst [vmem:[%s489_s2 + $0x58] sm:$0xff] %v289_v37 }
  0xe9   :  { %v119_v38 = vpop.f32.mrf.mxu0  ;;  %v159_v39 = vpop.f32.mrf.mxu1 }
  0xea   :  { %190 = vst [vmem:[%s489_s2 + $0x10] sm:$0xff] %v119_v38  ;;  %198 = vst [vmem:[%s489_s2 + $0x50] sm:$0xff] %v159_v39 }
  0xeb   :  { %v280_v40 = vpop.f32.mrf.mxu0  ;;  %v292_v41 = vpop.f32.mrf.mxu1 }
  0xec   :  { %193 = vst [vmem:[%s489_s2 + $0x28] sm:$0xff] %v280_v40  ;;  %201 = vst [vmem:[%s489_s2 + $0x68] sm:$0xff] %v292_v41 }
  0xed   :  { %v129_v42 = vpop.f32.mrf.mxu0  ;;  %v169_v43 = vpop.f32.mrf.mxu1 }
  0xee   :  { %192 = vst [vmem:[%s489_s2 + $0x20] sm:$0xff] %v129_v42  ;;  %200 = vst [vmem:[%s489_s2 + $0x60] sm:$0xff] %v169_v43 }
  0xef   :  { %v283_v44 = vpop.f32.mrf.mxu0  ;;  %v295_v45 = vpop.f32.mrf.mxu1 }
  0xf0   :  { %195 = vst [vmem:[%s489_s2 + $0x38] sm:$0xff] %v283_v44  ;;  %203 = vst [vmem:[%s489_s2 + $0x78] sm:$0xff] %v295_v45 }
  0xf1   :  { %v139_v46 = vpop.f32.mrf.mxu0  ;;  %v179_v47 = vpop.f32.mrf.mxu1 }
  0xf2   :  { %194 = vst [vmem:[%s489_s2 + $0x30] sm:$0xff] %v139_v46  ;;  %202 = vst [vmem:[%s489_s2 + $0x70] sm:$0xff] %v179_v47 }

// kernel: gcn_forward.7
= control target key start
LH: loop header
LB: loop body
LE: loop exit
PB: predicated region body
PF: predicated region fallthrough
CT: control target
= control target key end

     0   :  { %s451_s1 = inlined_call_operand.vmem [shape: f32[128,128], index: 1, kind: input, shape index: {}]   ;;  %s452_s0 = inlined_call_operand.vmem [shape: bf16[128,128], index: 0, kind: input, shape index: {}]   ;;  %s453_s2 = inlined_call_operand.vmem [shape: f32[1,128], index: 2, kind: input, shape index: {}]   ;;  %s454_s3 = inlined_call_operand.vmem [shape: f32[128,128], index: 3, kind: output, shape index: {}]  }
   0x1   :  { %v45_v0 = vld [vmem:[%s451_s1 + $0x70] sm:$0xff]  ;;  %v46_v1 = vld [vmem:[%s451_s1 + $0x78] sm:$0xff]  ;;  %v43_v2 = vld [vmem:[%s451_s1 + $0x60] sm:$0xff] }
   0x2   :  { %v54_v3 = vpack.c.bf16 %v46_v1, %v45_v0  ;;  %v44_v4 = vld [vmem:[%s451_s1 + $0x68] sm:$0xff]  ;;  %v41_v6 = vld [vmem:[%s451_s1 + $0x50] sm:$0xff]  ;;  %v42_v7 = vld [vmem:[%s451_s1 + $0x58] sm:$0xff] }
   0x3   :  { %v53_v5 = vpack.c.bf16 %v44_v4, %v43_v2  ;;  %v39_v8 = vld [vmem:[%s451_s1 + $0x40] sm:$0xff]  ;;  %v52_v9 = vpack.c.bf16 %v42_v7, %v41_v6  ;;  %v40_v10 = vld [vmem:[%s451_s1 + $0x48] sm:$0xff]  ;;  %v37_v14 = vld [vmem:[%s451_s1 + $0x30] sm:$0xff] }
   0x4   :  { %252 = vmatprep.subr.bf16.mxu0 %v54_v3  ;;  %284 = vmatprep.subr.bf16.mxu1 %v54_v3  ;;  %v300_v11 = vld [vmem:[%s452_s0] sm:$0xff]   ;;  %v51_v13 = vpack.c.bf16 %v40_v10, %v39_v8  ;;  %v38_v15 = vld [vmem:[%s451_s1 + $0x38] sm:$0xff]  ;;  %v36_v18 = vld [vmem:[%s451_s1 + $0x28] sm:$0xff] }
   0x5   :  { %253 = vmatpush3.bf16.msra.mxu0 %v54_v3  ;;  %292 = vmatpush3.bf16.msra.mxu1 %v54_v3  ;;  %v301_v12 = vld [vmem:[%s452_s0 + $0x20] sm:$0xff]   ;;  %v50_v16 = vpack.c.bf16 %v38_v15, %v37_v14  ;;  %v33_v20 = vld [vmem:[%s451_s1 + $0x10] sm:$0xff]  ;;  %v34_v21 = vld [vmem:[%s451_s1 + $0x18] sm:$0xff] }
   0x6   :  { %254 = vmatprep.subr.bf16.mxu0 %v53_v5  ;;  %285 = vmatprep.subr.bf16.mxu1 %v53_v5  ;;  %v35_v17 = vld [vmem:[%s451_s1 + $0x20] sm:$0xff]  ;;  %v48_v22 = vpack.c.bf16 %v34_v21, %v33_v20  ;;  %v32_v24 = vld [vmem:[%s451_s1 + $0x8] sm:$0xff]  ;;  %v304_v28 = vld [vmem:[%s452_s0 + $0x10] sm:$0xff]  }
   0x7   :  { %268 = vmatprep.mubr.bf16.mxu0 %v300_v11  ;;  %276 = vmatprep.mubr.bf16.mxu1 %v301_v12  ;;  %v49_v19 = vpack.c.bf16 %v36_v18, %v35_v17  ;;  %v31_v23 = vld [vmem:[%s451_s1] sm:$0xff]  ;;  %v302_v26 = vld [vmem:[%s452_s0 + $0x8] sm:$0xff]   ;;  %v305_v29 = vld [vmem:[%s452_s0 + $0x30] sm:$0xff]  }
   0x8   :  { %v47_v25 = vpack.c.bf16 %v32_v24, %v31_v23  ;;  %v303_v27 = vld [vmem:[%s452_s0 + $0x28] sm:$0xff]   ;;  %v306_v30 = vld [vmem:[%s452_s0 + $0x18] sm:$0xff]   ;;  %v227_v32 = vld [vmem:[%s453_s2] ss:$0 sm:$0xff] }
   0x9   :  { %255 = vmatpush3.bf16.msra.mxu0 %v53_v5  ;;  %293 = vmatpush3.bf16.msra.mxu1 %v53_v5  ;;  %v307_v31 = vld [vmem:[%s452_s0 + $0x38] sm:$0xff]  }
   0xa   :  { %256 = vmatprep.subr.bf16.mxu0 %v52_v9  ;;  %286 = vmatprep.subr.bf16.mxu1 %v52_v9 }
   0xd   :  { %257 = vmatpush3.bf16.msra.mxu0 %v52_v9  ;;  %294 = vmatpush3.bf16.msra.mxu1 %v52_v9 }
   0xe   :  { %258 = vmatprep.subr.bf16.mxu0 %v51_v13  ;;  %287 = vmatprep.subr.bf16.mxu1 %v51_v13 }
  0x11   :  { %259 = vmatpush3.bf16.msra.mxu0 %v51_v13  ;;  %295 = vmatpush3.bf16.msra.mxu1 %v51_v13 }
  0x12   :  { %260 = vmatprep.subr.bf16.mxu0 %v50_v16  ;;  %288 = vmatprep.subr.bf16.mxu1 %v50_v16 }
  0x15   :  { %261 = vmatpush3.bf16.msra.mxu0 %v50_v16  ;;  %296 = vmatpush3.bf16.msra.mxu1 %v50_v16 }
  0x16   :  { %262 = vmatprep.subr.bf16.mxu0 %v49_v19  ;;  %289 = vmatprep.subr.bf16.mxu1 %v49_v19 }
  0x19   :  { %263 = vmatpush3.bf16.msra.mxu0 %v49_v19  ;;  %297 = vmatpush3.bf16.msra.mxu1 %v49_v19 }
  0x1a   :  { %264 = vmatprep.subr.bf16.mxu0 %v48_v22  ;;  %290 = vmatprep.subr.bf16.mxu1 %v48_v22 }
  0x1d   :  { %265 = vmatpush3.bf16.msra.mxu0 %v48_v22  ;;  %298 = vmatpush3.bf16.msra.mxu1 %v48_v22 }
  0x1e   :  { %266 = vmatprep.subr.bf16.mxu0 %v47_v25  ;;  %291 = vmatprep.subr.bf16.mxu1 %v47_v25 }
  0x21   :  { %267 = vmatpush3.bf16.msra.mxu0 %v47_v25  ;;  %299 = vmatpush3.bf16.msra.mxu1 %v47_v25 }
  0x24   :  { %269 = vmatmul.mubr.bf16.vlgmr.msra.gmra.mxu0 %v302_v26  ;;  %277 = vmatmul.mubr.bf16.vlgmr.msra.gmra.mxu1 %v303_v27 }
  0x25   :  { %272 = vmatprep.mubr.bf16.mxu0 %v304_v28  ;;  %280 = vmatprep.mubr.bf16.mxu1 %v305_v29 }
  0x2c   :  { %273 = vmatmul.mubr.bf16.gmra.mxu0 %v306_v30  ;;  %281 = vmatmul.mubr.bf16.gmra.mxu1 %v307_v31 }
  0xe4   :  { %v270_v33 = vpop.f32.mrf.mxu0  ;;  %v278_v34 = vpop.f32.mrf.mxu1 }
  0xe5   :  { %v153_v35 = vadd.f32 %v270_v33, %v227_v32  ;;  %v185_v36 = vadd.f32 %v278_v34, %v227_v32 }
  0xe6   :  { %v144_v37 = vpop.f32.mrf.mxu0  ;;  %v176_v38 = vpop.f32.mrf.mxu1 }
  0xe7   :  { %209 = vst [vmem:[%s454_s3 + $0x10] sm:$0xff] %v153_v35  ;;  %217 = vst [vmem:[%s454_s3 + $0x50] sm:$0xff] %v185_v36  ;;  %v145_v39 = vadd.f32 %v227_v32, %v144_v37  ;;  %v177_v40 = vadd.f32 %v227_v32, %v176_v38 }
  0xe8   :  { %v271_v41 = vpop.f32.mrf.mxu0  ;;  %v279_v42 = vpop.f32.mrf.mxu1 }
  0xe9   :  { %207 = vst [vmem:[%s454_s3] sm:$0xff] %v145_v39  ;;  %215 = vst [vmem:[%s454_s3 + $0x40] sm:$0xff] %v177_v40  ;;  %v156_v43 = vadd.f32 %v271_v41, %v227_v32  ;;  %v188_v44 = vadd.f32 %v279_v42, %v227_v32 }
  0xea   :  { %v147_v45 = vpop.f32.mrf.mxu0  ;;  %v179_v46 = vpop.f32.mrf.mxu1 }
  0xeb   :  { %210 = vst [vmem:[%s454_s3 + $0x18] sm:$0xff] %v156_v43  ;;  %218 = vst [vmem:[%s454_s3 + $0x58] sm:$0xff] %v188_v44  ;;  %v148_v47 = vadd.f32 %v227_v32, %v147_v45  ;;  %v180_v48 = vadd.f32 %v227_v32, %v179_v46 }
  0xec   :  { %v274_v49 = vpop.f32.mrf.mxu0  ;;  %v282_v50 = vpop.f32.mrf.mxu1 }
  0xed   :  { %208 = vst [vmem:[%s454_s3 + $0x8] sm:$0xff] %v148_v47  ;;  %216 = vst [vmem:[%s454_s3 + $0x48] sm:$0xff] %v180_v48  ;;  %v169_v51 = vadd.f32 %v274_v49, %v227_v32  ;;  %v201_v52 = vadd.f32 %v282_v50, %v227_v32 }
  0xee   :  { %v160_v53 = vpop.f32.mrf.mxu0  ;;  %v192_v54 = vpop.f32.mrf.mxu1 }
  0xef   :  { %213 = vst [vmem:[%s454_s3 + $0x30] sm:$0xff] %v169_v51  ;;  %221 = vst [vmem:[%s454_s3 + $0x70] sm:$0xff] %v201_v52  ;;  %v161_v55 = vadd.f32 %v227_v32, %v160_v53  ;;  %v193_v56 = vadd.f32 %v227_v32, %v192_v54 }
  0xf0   :  { %v275_v57 = vpop.f32.mrf.mxu0  ;;  %v283_v58 = vpop.f32.mrf.mxu1 }
  0xf1   :  { %211 = vst [vmem:[%s454_s3 + $0x20] sm:$0xff] %v161_v55  ;;  %219 = vst [vmem:[%s454_s3 + $0x60] sm:$0xff] %v193_v56  ;;  %v172_v59 = vadd.f32 %v275_v57, %v227_v32  ;;  %v204_v60 = vadd.f32 %v283_v58, %v227_v32 }
  0xf2   :  { %v163_v61 = vpop.f32.mrf.mxu0  ;;  %v195_v62 = vpop.f32.mrf.mxu1 }
  0xf3   :  { %214 = vst [vmem:[%s454_s3 + $0x38] sm:$0xff] %v172_v59  ;;  %222 = vst [vmem:[%s454_s3 + $0x78] sm:$0xff] %v204_v60  ;;  %v164_v63 = vadd.f32 %v227_v32, %v163_v61  ;;  %v196_v0 = vadd.f32 %v227_v32, %v195_v62 }
  0xf5   :  { %212 = vst [vmem:[%s454_s3 + $0x28] sm:$0xff] %v164_v63  ;;  %220 = vst [vmem:[%s454_s3 + $0x68] sm:$0xff] %v196_v0 }

// kernel: gcn_forward.5
= control target key start
LH: loop header
LB: loop body
LE: loop exit
PB: predicated region body
PF: predicated region fallthrough
CT: control target
= control target key end

     0   :  { %s467_s1 = inlined_call_operand.vmem [shape: f32[128,128], index: 1, kind: input, shape index: {}]   ;;  %s468_s0 = inlined_call_operand.vmem [shape: bf16[128,128], index: 0, kind: input, shape index: {}]   ;;  %s469_s2 = inlined_call_operand.vmem [shape: f32[1,128], index: 2, kind: input, shape index: {}]   ;;  %s470_s3 = inlined_call_operand.vmem [shape: f32[128,128], index: 3, kind: output, shape index: {}]  }
   0x1   :  { %v45_v0 = vld [vmem:[%s467_s1 + $0x70] sm:$0xff]  ;;  %v46_v1 = vld [vmem:[%s467_s1 + $0x78] sm:$0xff]  ;;  %v43_v2 = vld [vmem:[%s467_s1 + $0x60] sm:$0xff] }
   0x2   :  { %v54_v3 = vpack.c.bf16 %v46_v1, %v45_v0  ;;  %v44_v4 = vld [vmem:[%s467_s1 + $0x68] sm:$0xff]  ;;  %v41_v6 = vld [vmem:[%s467_s1 + $0x50] sm:$0xff]  ;;  %v42_v7 = vld [vmem:[%s467_s1 + $0x58] sm:$0xff] }
   0x3   :  { %v53_v5 = vpack.c.bf16 %v44_v4, %v43_v2  ;;  %v39_v8 = vld [vmem:[%s467_s1 + $0x40] sm:$0xff]  ;;  %v52_v9 = vpack.c.bf16 %v42_v7, %v41_v6  ;;  %v40_v10 = vld [vmem:[%s467_s1 + $0x48] sm:$0xff]  ;;  %v37_v14 = vld [vmem:[%s467_s1 + $0x30] sm:$0xff] }
   0x4   :  { %268 = vmatprep.subr.bf16.mxu0 %v54_v3  ;;  %300 = vmatprep.subr.bf16.mxu1 %v54_v3  ;;  %v316_v11 = vld [vmem:[%s468_s0] sm:$0xff]   ;;  %v51_v13 = vpack.c.bf16 %v40_v10, %v39_v8  ;;  %v38_v15 = vld [vmem:[%s467_s1 + $0x38] sm:$0xff]  ;;  %v36_v18 = vld [vmem:[%s467_s1 + $0x28] sm:$0xff] }
   0x5   :  { %269 = vmatpush3.bf16.msra.mxu0 %v54_v3  ;;  %308 = vmatpush3.bf16.msra.mxu1 %v54_v3  ;;  %v317_v12 = vld [vmem:[%s468_s0 + $0x20] sm:$0xff]   ;;  %v50_v16 = vpack.c.bf16 %v38_v15, %v37_v14  ;;  %v33_v20 = vld [vmem:[%s467_s1 + $0x10] sm:$0xff]  ;;  %v34_v21 = vld [vmem:[%s467_s1 + $0x18] sm:$0xff] }
   0x6   :  { %270 = vmatprep.subr.bf16.mxu0 %v53_v5  ;;  %301 = vmatprep.subr.bf16.mxu1 %v53_v5  ;;  %v35_v17 = vld [vmem:[%s467_s1 + $0x20] sm:$0xff]  ;;  %v48_v22 = vpack.c.bf16 %v34_v21, %v33_v20  ;;  %v32_v24 = vld [vmem:[%s467_s1 + $0x8] sm:$0xff]  ;;  %v320_v28 = vld [vmem:[%s468_s0 + $0x10] sm:$0xff]  }
   0x7   :  { %284 = vmatprep.mubr.bf16.mxu0 %v316_v11  ;;  %292 = vmatprep.mubr.bf16.mxu1 %v317_v12  ;;  %v49_v19 = vpack.c.bf16 %v36_v18, %v35_v17  ;;  %v31_v23 = vld [vmem:[%s467_s1] sm:$0xff]  ;;  %v318_v26 = vld [vmem:[%s468_s0 + $0x8] sm:$0xff]   ;;  %v321_v29 = vld [vmem:[%s468_s0 + $0x30] sm:$0xff]  }
   0x8   :  { %v47_v25 = vpack.c.bf16 %v32_v24, %v31_v23  ;;  %v319_v27 = vld [vmem:[%s468_s0 + $0x28] sm:$0xff]   ;;  %v322_v30 = vld [vmem:[%s468_s0 + $0x18] sm:$0xff]   ;;  %v243_v32 = vld [vmem:[%s469_s2] ss:$0 sm:$0xff] }
   0x9   :  { %271 = vmatpush3.bf16.msra.mxu0 %v53_v5  ;;  %309 = vmatpush3.bf16.msra.mxu1 %v53_v5  ;;  %v323_v31 = vld [vmem:[%s468_s0 + $0x38] sm:$0xff]  }
   0xa   :  { %272 = vmatprep.subr.bf16.mxu0 %v52_v9  ;;  %302 = vmatprep.subr.bf16.mxu1 %v52_v9 }
   0xd   :  { %273 = vmatpush3.bf16.msra.mxu0 %v52_v9  ;;  %310 = vmatpush3.bf16.msra.mxu1 %v52_v9 }
   0xe   :  { %274 = vmatprep.subr.bf16.mxu0 %v51_v13  ;;  %303 = vmatprep.subr.bf16.mxu1 %v51_v13 }
  0x11   :  { %275 = vmatpush3.bf16.msra.mxu0 %v51_v13  ;;  %311 = vmatpush3.bf16.msra.mxu1 %v51_v13 }
  0x12   :  { %276 = vmatprep.subr.bf16.mxu0 %v50_v16  ;;  %304 = vmatprep.subr.bf16.mxu1 %v50_v16 }
  0x15   :  { %277 = vmatpush3.bf16.msra.mxu0 %v50_v16  ;;  %312 = vmatpush3.bf16.msra.mxu1 %v50_v16 }
  0x16   :  { %278 = vmatprep.subr.bf16.mxu0 %v49_v19  ;;  %305 = vmatprep.subr.bf16.mxu1 %v49_v19 }
  0x19   :  { %279 = vmatpush3.bf16.msra.mxu0 %v49_v19  ;;  %313 = vmatpush3.bf16.msra.mxu1 %v49_v19 }
  0x1a   :  { %280 = vmatprep.subr.bf16.mxu0 %v48_v22  ;;  %306 = vmatprep.subr.bf16.mxu1 %v48_v22 }
  0x1d   :  { %281 = vmatpush3.bf16.msra.mxu0 %v48_v22  ;;  %314 = vmatpush3.bf16.msra.mxu1 %v48_v22 }
  0x1e   :  { %282 = vmatprep.subr.bf16.mxu0 %v47_v25  ;;  %307 = vmatprep.subr.bf16.mxu1 %v47_v25 }
  0x21   :  { %283 = vmatpush3.bf16.msra.mxu0 %v47_v25  ;;  %315 = vmatpush3.bf16.msra.mxu1 %v47_v25 }
  0x24   :  { %285 = vmatmul.mubr.bf16.vlgmr.msra.gmra.mxu0 %v318_v26  ;;  %293 = vmatmul.mubr.bf16.vlgmr.msra.gmra.mxu1 %v319_v27 }
  0x25   :  { %288 = vmatprep.mubr.bf16.mxu0 %v320_v28  ;;  %296 = vmatprep.mubr.bf16.mxu1 %v321_v29 }
  0x2c   :  { %289 = vmatmul.mubr.bf16.gmra.mxu0 %v322_v30  ;;  %297 = vmatmul.mubr.bf16.gmra.mxu1 %v323_v31 }
  0xe4   :  { %v286_v33 = vpop.f32.mrf.mxu0  ;;  %v294_v34 = vpop.f32.mrf.mxu1 }
  0xe5   :  { %v153_v35 = vadd.f32 %v286_v33, %v243_v32  ;;  %v185_v36 = vadd.f32 %v294_v34, %v243_v32 }
  0xe6   :  { %v144_v37 = vpop.f32.mrf.mxu0  ;;  %v176_v38 = vpop.f32.mrf.mxu1 }
  0xe7   :  { %v209_v39 = vmax.f32 %v153_v35, 0.0  ;;  %v217_v40 = vmax.f32 %v185_v36, 0.0  ;;  %v145_v41 = vadd.f32 %v243_v32, %v144_v37  ;;  %v177_v42 = vadd.f32 %v243_v32, %v176_v38 }
  0xe8   :  { %v287_v43 = vpop.f32.mrf.mxu0  ;;  %v295_v44 = vpop.f32.mrf.mxu1 }
  0xe9   :  { %225 = vst [vmem:[%s470_s3 + $0x10] sm:$0xff] %v209_v39  ;;  %233 = vst [vmem:[%s470_s3 + $0x50] sm:$0xff] %v217_v40  ;;  %v207_v45 = vmax.f32 %v145_v41, 0.0  ;;  %v215_v46 = vmax.f32 %v177_v42, 0.0  ;;  %v156_v47 = vadd.f32 %v287_v43, %v243_v32  ;;  %v188_v48 = vadd.f32 %v295_v44, %v243_v32 }
  0xea   :  { %v147_v49 = vpop.f32.mrf.mxu0  ;;  %v179_v50 = vpop.f32.mrf.mxu1 }
  0xeb   :  { %223 = vst [vmem:[%s470_s3] sm:$0xff] %v207_v45  ;;  %231 = vst [vmem:[%s470_s3 + $0x40] sm:$0xff] %v215_v46  ;;  %v210_v51 = vmax.f32 %v156_v47, 0.0  ;;  %v218_v52 = vmax.f32 %v188_v48, 0.0  ;;  %v148_v53 = vadd.f32 %v243_v32, %v147_v49  ;;  %v180_v54 = vadd.f32 %v243_v32, %v179_v50 }
  0xec   :  { %v290_v55 = vpop.f32.mrf.mxu0  ;;  %v298_v56 = vpop.f32.mrf.mxu1 }
  0xed   :  { %226 = vst [vmem:[%s470_s3 + $0x18] sm:$0xff] %v210_v51  ;;  %234 = vst [vmem:[%s470_s3 + $0x58] sm:$0xff] %v218_v52  ;;  %v208_v57 = vmax.f32 %v148_v53, 0.0  ;;  %v216_v58 = vmax.f32 %v180_v54, 0.0  ;;  %v169_v59 = vadd.f32 %v290_v55, %v243_v32  ;;  %v201_v60 = vadd.f32 %v298_v56, %v243_v32 }
  0xee   :  { %v160_v61 = vpop.f32.mrf.mxu0  ;;  %v192_v62 = vpop.f32.mrf.mxu1 }
  0xef   :  { %224 = vst [vmem:[%s470_s3 + $0x8] sm:$0xff] %v208_v57  ;;  %232 = vst [vmem:[%s470_s3 + $0x48] sm:$0xff] %v216_v58  ;;  %v213_v63 = vmax.f32 %v169_v59, 0.0  ;;  %v221_v0 = vmax.f32 %v201_v60, 0.0  ;;  %v161_v1 = vadd.f32 %v243_v32, %v160_v61  ;;  %v193_v2 = vadd.f32 %v243_v32, %v192_v62 }
  0xf0   :  { %v291_v3 = vpop.f32.mrf.mxu0  ;;  %v299_v4 = vpop.f32.mrf.mxu1 }
  0xf1   :  { %229 = vst [vmem:[%s470_s3 + $0x30] sm:$0xff] %v213_v63  ;;  %237 = vst [vmem:[%s470_s3 + $0x70] sm:$0xff] %v221_v0  ;;  %v211_v5 = vmax.f32 %v161_v1, 0.0  ;;  %v219_v6 = vmax.f32 %v193_v2, 0.0  ;;  %v172_v7 = vadd.f32 %v291_v3, %v243_v32  ;;  %v204_v8 = vadd.f32 %v299_v4, %v243_v32 }
  0xf2   :  { %v163_v9 = vpop.f32.mrf.mxu0  ;;  %v195_v10 = vpop.f32.mrf.mxu1 }
  0xf3   :  { %227 = vst [vmem:[%s470_s3 + $0x20] sm:$0xff] %v211_v5  ;;  %235 = vst [vmem:[%s470_s3 + $0x60] sm:$0xff] %v219_v6  ;;  %v214_v11 = vmax.f32 %v172_v7, 0.0  ;;  %v222_v12 = vmax.f32 %v204_v8, 0.0  ;;  %v164_v13 = vadd.f32 %v243_v32, %v163_v9  ;;  %v196_v14 = vadd.f32 %v243_v32, %v195_v10 }
  0xf5   :  { %230 = vst [vmem:[%s470_s3 + $0x38] sm:$0xff] %v214_v11  ;;  %238 = vst [vmem:[%s470_s3 + $0x78] sm:$0xff] %v222_v12  ;;  %v212_v15 = vmax.f32 %v164_v13, 0.0  ;;  %v220_v16 = vmax.f32 %v196_v14, 0.0 }
  0xf7   :  { %228 = vst [vmem:[%s470_s3 + $0x28] sm:$0xff] %v212_v15  ;;  %236 = vst [vmem:[%s470_s3 + $0x68] sm:$0xff] %v220_v16 }

</bundles_post_ra>
